<compile_context>
chip_gen: v7x
topology: tpu7x:2x2x1
jax: 0.10.0
libtpu: 0.0.40
codegen_flags: <defaults>
</compile_context>

<pallas_src>
import functools

import jax
import jax.numpy as jnp
from jax.experimental import pallas as pl
from jax.experimental.pallas import tpu as pltpu


def _round_up(x: int, m: int) -> int:
    return ((x + m - 1) // m) * m


def _linear_tanh_kernel_single_k(x_ref, w_ref, b_ref, o_ref):
    """Whole K resident in VMEM: one dot + bias + tanh per (tm, tn) tile."""
    acc = jnp.dot(
        x_ref[...].astype(jnp.bfloat16),
        w_ref[...].astype(jnp.bfloat16),
        preferred_element_type=jnp.float32,
    )
    o_ref[...] = jnp.tanh(acc + b_ref[...]).astype(o_ref.dtype)


def _linear_tanh_kernel_multi_k(x_ref, w_ref, b_ref, o_ref, acc_ref):
    """One (tm, tn) output tile, accumulated over the K grid axis."""
    k = pl.program_id(2)

    partial = jnp.dot(
        x_ref[...].astype(jnp.bfloat16),
        w_ref[...].astype(jnp.bfloat16),
        preferred_element_type=jnp.float32,
    )

    # First K step writes directly (saves a zero-init store + VPU add).
    @pl.when(k == 0)
    def _first():
        acc_ref[...] = partial

    @pl.when(k > 0)
    def _accum():
        acc_ref[...] += partial

    @pl.when(k == pl.num_programs(2) - 1)
    def _finalize():
        # Bias + tanh applied exactly once, in f32, then cast to output dtype.
        o_ref[...] = jnp.tanh(acc_ref[...] + b_ref[...]).astype(o_ref.dtype)


@functools.partial(jax.jit, static_argnames=("tm", "tn", "tk"))
def layer_forward(x, w_t, b, *, tm=256, tn=512, tk=512):
    """Pallas equivalent of: tanh(x @ W^T + b).

    x   : (M, K)  float32
    w_t : (K, N)  float32   (PyTorch weight (N, K) transposed in the wrapper)
    b   : (1, N)  float32
    """
    M, K = x.shape
    Kw, N = w_t.shape
    assert Kw == K and b.shape == (1, N)
    out_dtype = x.dtype

    # Clamp tile sizes to the (padded) problem.  f32 tiles in VMEM want
    # sublane multiples of 8 and lane multiples of 128 (lane-dense stores).
    tm = min(tm, _round_up(M, 8))
    tn = min(tn, _round_up(N, 128))

    # Single-K fast path when the whole reduction fits comfortably in VMEM.
    k_pad128 = _round_up(K, 128)
    single_k = k_pad128 <= 2048
    tk = k_pad128 if single_k else min(tk, k_pad128)

    Mp = _round_up(M, tm)
    Np = _round_up(N, tn)
    Kp = _round_up(K, tk)

    # Pad only when needed (zero-pad is matmul-neutral).  No dtype copies in
    # the wrapper: operands stay f32 in HBM and are cast to bf16 in-kernel.
    x_p = x if (Mp == M and Kp == K) else jnp.pad(x, ((0, Mp - M), (0, Kp - K)))
    w_p = w_t if (Kp == K and Np == N) else jnp.pad(w_t, ((0, Kp - K), (0, Np - N)))
    b_p = b if Np == N else jnp.pad(b, ((0, 0), (0, Np - N)))

    gm, gn, gk = Mp // tm, Np // tn, Kp // tk

    # Advisory cost estimate with real dtypes and re-streaming factors:
    # x is re-read gn times, w is re-read gm times (f32 operands in HBM).
    cost = pl.CostEstimate(
        flops=2 * M * N * K,
        transcendentals=M * N,
        bytes_accessed=(
            4 * Mp * Kp * gn          # x streams
            + 4 * Kp * Np * gm        # w streams
            + 4 * Mp * Np             # output writeback
            + 4 * Np * gm             # bias re-reads
        ),
    )

    if single_k:
        grid = (gm, gn)
        out_p = pl.pallas_call(
            _linear_tanh_kernel_single_k,
            out_shape=jax.ShapeDtypeStruct((Mp, Np), out_dtype),
            grid_spec=pltpu.PrefetchScalarGridSpec(
                num_scalar_prefetch=0,
                grid=grid,
                in_specs=[
                    pl.BlockSpec((tm, Kp), lambda i, j: (i, 0)),  # x row-block
                    pl.BlockSpec((Kp, tn), lambda i, j: (0, j)),  # w col-block
                    pl.BlockSpec((1, tn), lambda i, j: (0, j)),   # bias row
                ],
                out_specs=pl.BlockSpec((tm, tn), lambda i, j: (i, j)),
            ),
            compiler_params=pltpu.CompilerParams(
                # Both axes independent -> megacore-shardable on v7x.
                dimension_semantics=("parallel", "parallel"),
            ),
            cost_estimate=cost,
        )(x_p, w_p, b_p)
    else:
        grid = (gm, gn, gk)
        out_p = pl.pallas_call(
            _linear_tanh_kernel_multi_k,
            out_shape=jax.ShapeDtypeStruct((Mp, Np), out_dtype),
            grid_spec=pltpu.PrefetchScalarGridSpec(
                num_scalar_prefetch=0,
                grid=grid,
                in_specs=[
                    pl.BlockSpec((tm, tk), lambda i, j, k: (i, k)),  # x tile
                    pl.BlockSpec((tk, tn), lambda i, j, k: (k, j)),  # w tile
                    pl.BlockSpec((1, tn), lambda i, j, k: (0, j)),   # bias row
                ],
                out_specs=pl.BlockSpec((tm, tn), lambda i, j, k: (i, j)),
                scratch_shapes=[pltpu.VMEM((tm, tn), jnp.float32)],  # f32 acc
            ),
            compiler_params=pltpu.CompilerParams(
                # M/N independent (megacore-shardable on v7x), K is the
                # reduction axis (kept innermost, marked arbitrary).
                dimension_semantics=("parallel", "parallel", "arbitrary"),
            ),
            cost_estimate=cost,
        )(x_p, w_p, b_p)

    # Strip padding back to the logical output.
    return out_p[:M, :N]


def _reference_bf16(x, w_t, b):
    """Matches kernel semantics: bf16 operands, f32 accumulate, f32 epilogue."""
    return jnp.tanh(
        jnp.dot(
            x.astype(jnp.bfloat16),
            w_t.astype(jnp.bfloat16),
            preferred_element_type=jnp.float32,
        )
        + b
    )


if __name__ == "__main__":
    key = jax.random.PRNGKey(0)

    # --- Test 1: small shapes consistent with Layer(in=32, out=64, nonlin=Tanh)
    #     (exercises the single-K fast path).
    batch, in_features, out_features = 8, 32, 64
    kx, kw, kb, k2 = jax.random.split(key, 4)

    bound = 1.0 / jnp.sqrt(jnp.float32(in_features))
    weight = jax.random.uniform(
        kw, (out_features, in_features), jnp.float32, minval=-bound, maxval=bound
    )  # PyTorch layout (out, in)
    bias = jax.random.uniform(
        kb, (out_features,), jnp.float32, minval=-bound, maxval=bound
    )
    x = jax.random.normal(kx, (batch, in_features), jnp.float32)

    w_t = weight.T                        # (K, N)
    b_row = bias.reshape(1, out_features)

    out = layer_forward(x, w_t, b_row)
    out = jax.block_until_ready(out)
    assert out.shape == (batch, out_features)

    ref_bf16 = _reference_bf16(x, w_t, b_row)
    ref_f32 = jnp.tanh(x @ w_t + b_row)
    assert jnp.allclose(out, ref_bf16, atol=2e-3, rtol=2e-3)
    assert jnp.allclose(out, ref_f32, atol=3e-2, rtol=3e-2)

    # --- Test 2: K > 2048 to exercise the multi-K accumulation path.
    M2, K2, N2 = 160, 2304, 200
    kx2, kw2, kb2 = jax.random.split(k2, 3)
    x2 = jax.random.normal(kx2, (M2, K2), jnp.float32)
    w2_t = (
        jax.random.normal(kw2, (N2, K2), jnp.float32) / jnp.sqrt(jnp.float32(K2))
    ).T
    b2 = jax.random.normal(kb2, (1, N2), jnp.float32) * 0.01

    out2 = layer_forward(x2, w2_t, b2)
    out2 = jax.block_until_ready(out2)
    assert out2.shape == (M2, N2)

    ref2_bf16 = _reference_bf16(x2, w2_t, b2)
    ref2_f32 = jnp.tanh(x2 @ w2_t + b2)
    assert jnp.allclose(out2, ref2_bf16, atol=2e-3, rtol=2e-3)
    assert jnp.allclose(out2, ref2_f32, atol=3e-2, rtol=3e-2)

    print("KERNEL_OK")
</pallas_src>

<mosaic_0001>
module attributes {stable_mosaic.version = 11 : i64} {
  func.func @_linear_tanh_kernel_single_k(%arg0: i32, %arg1: i32, %arg2: memref<8x128xf32, #tpu.memory_space<vmem>>, %arg3: memref<128x128xf32, #tpu.memory_space<vmem>>, %arg4: memref<1x128xf32, #tpu.memory_space<vmem>>, %arg5: memref<8x128xf32, #tpu.memory_space<vmem>>) attributes {dimension_semantics = [#tpu.dimension_semantics<parallel>, #tpu.dimension_semantics<parallel>], iteration_bounds = array<i64: 1, 1>, scalar_prefetch = 0 : i64, scratch_operands = 0 : i64, tpu.core_type = #tpu.core_type<tc>, window_params = [{transform_indices = @transform_0, window_bounds = array<i64: 8, 128>}, {transform_indices = @transform_1, window_bounds = array<i64: 128, 128>}, {transform_indices = @transform_2, window_bounds = array<i64: 1, 128>}, {transform_indices = @transform_3, window_bounds = array<i64: 8, 128>}]} {
    %c0 = arith.constant 0 : index
    %c0_0 = arith.constant 0 : index
    %0 = vector.load %arg2[%c0, %c0_0] : memref<8x128xf32, #tpu.memory_space<vmem>>, vector<8x128xf32>
    %1 = arith.truncf %0 : vector<8x128xf32> to vector<8x128xbf16>
    %c0_1 = arith.constant 0 : index
    %c0_2 = arith.constant 0 : index
    %2 = vector.load %arg3[%c0_1, %c0_2] : memref<128x128xf32, #tpu.memory_space<vmem>>, vector<128x128xf32>
    %3 = arith.truncf %2 : vector<128x128xf32> to vector<128x128xbf16>
    %cst = arith.constant dense<0.000000e+00> : vector<8x128xf32>
    %4 = tpu.matmul %1, %3, %cst {dimension_numbers = #tpu.dot_dimension_numbers<[1], [0], [0], [1], [0, 0, 1, 1], [], []>} : vector<8x128xbf16>, vector<128x128xbf16>, vector<8x128xf32> -> vector<8x128xf32>
    %c0_3 = arith.constant 0 : index
    %c0_4 = arith.constant 0 : index
    %5 = vector.load %arg4[%c0_3, %c0_4] : memref<1x128xf32, #tpu.memory_space<vmem>>, vector<1x128xf32>
    %6 = vector.broadcast %5 : vector<1x128xf32> to vector<8x128xf32>
    %7 = arith.addf %4, %6 : vector<8x128xf32>
    %8 = math.tanh %7 : vector<8x128xf32>
    %c0_5 = arith.constant 0 : index
    %c0_6 = arith.constant 0 : index
    %9 = vector.load %arg5[%c0_5, %c0_6] : memref<8x128xf32, #tpu.memory_space<vmem>>, vector<8x128xf32>
    tpu.vector_store %arg5[%c0_5, %c0_6], %8 {strides = array<i32>} : memref<8x128xf32, #tpu.memory_space<vmem>>, vector<8x128xf32>,
    return
  }
  func.func @transform_0(%arg0: i32, %arg1: i32) -> (i32, i32) {
    %c0_i32 = arith.constant 0 : i32
    %c0_i32_0 = arith.constant 0 : i32
    return %arg0, %c0_i32 : i32, i32
  }
  func.func @transform_1(%arg0: i32, %arg1: i32) -> (i32, i32) {
    %c0_i32 = arith.constant 0 : i32
    %c0_i32_0 = arith.constant 0 : i32
    return %c0_i32, %arg1 : i32, i32
  }
  func.func @transform_2(%arg0: i32, %arg1: i32) -> (i32, i32) {
    %c0_i32 = arith.constant 0 : i32
    %c0_i32_0 = arith.constant 0 : i32
    return %c0_i32, %arg1 : i32, i32
  }
  func.func @transform_3(%arg0: i32, %arg1: i32) -> (i32, i32) {
    %c0_i32 = arith.constant 0 : i32
    return %arg0, %arg1 : i32, i32
  }
}

</mosaic_0001>

<bundles_post_ra>
// kernel: layer_forward.1
= control target key start
LH: loop header
LB: loop body
LE: loop exit
PB: predicated region body
PF: predicated region fallthrough
CT: control target
= control target key end

     0   :  { %v164_v3 = vmov 0.0   ;;  %vm165_vm0 = vmmov 0   ;;  %s253_s0 = inlined_call_operand.vmem [shape: f32[8,128], index: 0, kind: input, shape index: {}]   ;;  %s254_s1 = inlined_call_operand.vmem [shape: f32[128,128], index: 1, kind: input, shape index: {}]   ;;  %s255_s2 = inlined_call_operand.vmem [shape: f32[1,128], index: 2, kind: input, shape index: {}]   ;;  %s256_s3 = inlined_call_operand.hbm [shape: f32[8,128], index: 3, kind: output, shape index: {}]  }
   0x1   :  { %v18_v0 = vld [vmem:[%s254_s1] sm:$0xff]  ;;  %v19_v1 = vld [vmem:[%s254_s1 + $0x8] sm:$0xff]  ;;  %v20_v2 = vld [vmem:[%s254_s1 + $0x10] sm:$0xff]  ;;  %115 = vmatprep.subr.bf16.mxu0 %v164_v3  ;;  %131 = vmatprep.mubr.msk.bf16.mxu0 %vm165_vm0, %v164_v3 }
   0x2   :  { %v34_v4 = vpack.c.bf16 %v19_v1, %v18_v0  ;;  %v21_v5 = vld [vmem:[%s254_s1 + $0x18] sm:$0xff]  ;;  %v22_v7 = vld [vmem:[%s254_s1 + $0x20] sm:$0xff]  ;;  %v23_v8 = vld [vmem:[%s254_s1 + $0x28] sm:$0xff] }
   0x3   :  { %v35_v6 = vpack.c.bf16 %v21_v5, %v20_v2 }
   0x4   :  { %116 = vmatpush3.bf16.msra.mxu0 %v34_v4 }
   0x5   :  { %117 = vmatprep.subr.bf16.mxu0 %v164_v3 }
   0x6   :  { %8 = vsyncpa [#allocation3], 0  ;;  %v36_v9 = vpack.c.bf16 %v23_v8, %v22_v7  ;;  %v24_v10 = vld [vmem:[%s254_s1 + $0x30] sm:$0xff]  ;;  %v25_v11 = vld [vmem:[%s254_s1 + $0x38] sm:$0xff] }
   0x7   :  { %v37_v12 = vpack.c.bf16 %v25_v11, %v24_v10  ;;  %v26_v13 = vld [vmem:[%s254_s1 + $0x40] sm:$0xff]  ;;  %v27_v14 = vld [vmem:[%s254_s1 + $0x48] sm:$0xff]  ;;  %v28_v16 = vld [vmem:[%s254_s1 + $0x50] sm:$0xff] }
   0x8   :  { %118 = vmatpush3.bf16.msra.mxu0 %v35_v6  ;;  %v38_v15 = vpack.c.bf16 %v27_v14, %v26_v13  ;;  %v29_v17 = vld [vmem:[%s254_s1 + $0x58] sm:$0xff]  ;;  %v30_v19 = vld [vmem:[%s254_s1 + $0x60] sm:$0xff]  ;;  %v31_v20 = vld [vmem:[%s254_s1 + $0x68] sm:$0xff] }
   0x9   :  { %119 = vmatprep.subr.bf16.mxu0 %v164_v3  ;;  %v39_v18 = vpack.c.bf16 %v29_v17, %v28_v16  ;;  %v40_v21 = vpack.c.bf16 %v31_v20, %v30_v19  ;;  %v32_v22 = vld [vmem:[%s254_s1 + $0x70] sm:$0xff]  ;;  %v33_v23 = vld [vmem:[%s254_s1 + $0x78] sm:$0xff]  ;;  %v16_v25 = vld [vmem:[%s253_s0] sm:$0xff]  ;;  %s166_s1 = smov [#allocation2]  }
   0xa   :  { %v41_v24 = vpack.c.bf16 %v33_v23, %v32_v22  ;;  %v17_v26 = vpack.c.bf16 %v16_v25, %v16_v25  ;;  %v105_v27 = vld [vmem:[%s255_s2] ss:$0 sm:$0xff]  ;;  %s97_s21 = sshll.u32 %s166_s1, 4  ;;  %s98_s21 = int_to_ptr.vmem [resolvable:$true] %s97_s21 }
   0xb   :  { %s140_s0 = scalar_lea.vmem %s98_s21, 128  ;;  %p145_p1 = scmp.lt.s32.totalorder %s98_s21, %s98_s21 }
   0xc   :  { %120 = vmatpush3.bf16.msra.mxu0 %v36_v9  ;;  %p141_p0 = scmp.ne.s32.totalorder %s98_s21, %s140_s0  ;;  %p146_p2 = scmp.lt.s32.totalorder %s140_s0, %s140_s0 }
   0xd   :  { %121 = vmatprep.subr.bf16.mxu0 %v164_v3 }
   0xe   :  { %p147_p3 = por %p146_p2, %p145_p1 }
  0x10   :  { %122 = vmatpush3.bf16.msra.mxu0 %v37_v12  ;;  %p148_p4 = pnand %p147_p3, %p141_p0 }
  0x11   :  { %123 = vmatprep.subr.bf16.mxu0 %v164_v3 }
  0x14   :  { %124 = vmatpush3.bf16.msra.mxu0 %v38_v15 }
  0x15   :  { %125 = vmatprep.subr.bf16.mxu0 %v164_v3 }
  0x18   :  { %126 = vmatpush3.bf16.msra.mxu0 %v39_v18 }
  0x19   :  { %127 = vmatprep.subr.bf16.mxu0 %v164_v3 }
  0x1c   :  { %128 = vmatpush3.bf16.msra.mxu0 %v40_v21 }
  0x1d   :  { %129 = vmatprep.subr.bf16.mxu0 %v164_v3 }
  0x20   :  { %130 = vmatpush3.bf16.msra.mxu0 %v41_v24 }
  0x23   :  { %132 = vmatmul.mubr.bf16.vlgmr.msra.gmra.mrb[0].mxu0 %v17_v26 }
  0xf6   :  { %v83_v28 = vpop.f32.mrb[0].mxu0 }
  0xf7   :  { %v84_v29 = vadd.f32 %v105_v27, %v83_v28  ;;  %v133_v30 = vpop.f32.mrb[1].mxu0 }
  0xf8   :  { %v86_v31 = vpop.f32.mrb[2].mxu0 }
  0xf9   :  { %138 = vtanh.f32 %v84_v29  ;;  %v134_v32 = vpop.f32.mrb[3].mxu0 }
 0x103   :  { %v139_v33 = vpop.eup %138 }
 0x104   :  { %90 = vst [vmem:[#allocation2] sm:$0xff] %v139_v33 }
 0x105   :  { %151 = shalt.err (!%p148_p4)
}
 0x106   :  { %s152_s23 = scalar_lea.hbm %s256_s3, 128 }
 0x107   :  { %p153_p5 = scmp.ne.s32.totalorder %s256_s3, %s152_s23  ;;  %p156_p6 = scmp.lt.u32.totalorder %s152_s23, %s256_s3 }
 0x109   :  { %p158_p7 = pnand %p156_p6, %p153_p5 }
 0x10b   :  { %161 = shalt.err (!%p158_p7)
}
 0x10c   :  { %100 = dma.vmem_to_hbm [thread:$0]  %s98_s21, 128, %s256_s3, [#allocation3]  }
 0x10d   :  { %162 = dma.done.wait [#allocation3], 128  }
 0x10e   :  { %163 = vsyncadd [#allocation3], 4294967168 }
 0x10f   :  { %104 = vsyncpa [#allocation3], 1 }

</bundles_post_ra>
